<compile_context>
chip_gen: v7x
topology: tpu7x:2x2x1
jax: 0.10.0
libtpu: 0.0.40
codegen_flags: <defaults>
</compile_context>

<pallas_src>
import functools

import jax
import jax.numpy as jnp
from jax import lax
from jax.experimental import pallas as pl
from jax.experimental.pallas import tpu as pltpu


def _channel_shuffle_kernel(x_ref, o_ref, *, groups):
    """x_ref / o_ref: (TB, C, TL) block (TB batch elements fused per block).

    Pure row permutation done as `cpg` copies:
        o[:, p*groups : (p+1)*groups, :] = x[:, p::cpg, :]
    i.e. strided sublane load (stride = cpg, 2-3 vld slots available) feeding a
    contiguous sublane store (keeps the single/1+1 vst slot dense & unmasked).
    """
    C = x_ref.shape[1]
    cpg = C // groups
    if groups == 1 or cpg == 1:
        # Identity permutation.
        o_ref[...] = x_ref[...]
    else:
        for p in range(cpg):  # static, unrolled
            o_ref[:, pl.ds(p * groups, groups), :] = (
                x_ref[:, pl.ds(p, groups, stride=cpg), :]
            )


def _choose_tiling(B, C, L, itemsize):
    """Pick (batch_tile, lane_tile, vmem_limit_bytes) with MiB-scale blocks.

    Pipeline footprint = 2 buffers x (in + out) x block_bytes = 4 x block_bytes,
    so block_budget = pipeline_budget / 4.  Budgets are generation aware:
      * v5e / v6e (128 MiB physical VMEM): ~48 MiB pipeline, 96 MiB limit
      * v7x       ( 64 MiB per TC)       : ~40 MiB pipeline, 56 MiB limit
    """
    try:
        vmem_cap = int(pltpu.get_tpu_info().vmem_capacity_bytes)
    except Exception:
        vmem_cap = 64 * 1024 * 1024  # conservative (v7x-sized) fallback

    if vmem_cap >= 96 * 1024 * 1024:          # v5e / v6e
        pipeline_budget = 48 * 1024 * 1024
        vmem_limit = 96 * 1024 * 1024
    else:                                      # v7x (64 MiB per TC)
        pipeline_budget = 40 * 1024 * 1024
        vmem_limit = 56 * 1024 * 1024
    block_budget = pipeline_budget // 4

    slab = C * L * itemsize                    # one full batch element
    if slab <= block_budget:
        # Whole length per block; fuse as many batch elements as fit.
        tl = L
        tb = int(min(B, max(1, block_budget // slab)))
    else:
        # Single batch element per block; tile the lane axis in 128-multiples.
        tb = 1
        if L <= 128:
            tl = L                              # full-extent lane dim is legal
        else:
            tl = max(128, ((block_budget // (C * itemsize)) // 128) * 128)
            # (slab > block_budget guarantees tl < L; tail block may be masked)

    # Make sure the limit always covers the actual double-buffered footprint
    # (guards the very-large-C edge case), without exceeding physical VMEM.
    vmem_limit = max(vmem_limit, 4 * tb * C * tl * itemsize + (2 << 20))
    vmem_limit = min(vmem_limit, vmem_cap)
    return tb, tl, int(vmem_limit)


def _channel_shuffle_impl(x, groups):
    B, C, L = x.shape
    itemsize = jnp.dtype(x.dtype).itemsize
    tb, tl, vmem_limit = _choose_tiling(B, C, L, itemsize)
    grid = (pl.cdiv(B, tb), pl.cdiv(L, tl))

    kernel = functools.partial(_channel_shuffle_kernel, groups=groups)

    return pl.pallas_call(
        kernel,
        out_shape=jax.ShapeDtypeStruct((B, C, L), x.dtype),
        grid_spec=pltpu.PrefetchScalarGridSpec(
            num_scalar_prefetch=0,
            grid=grid,
            in_specs=[pl.BlockSpec((tb, C, tl), lambda b, l: (b, 0, l))],
            out_specs=pl.BlockSpec((tb, C, tl), lambda b, l: (b, 0, l)),
        ),
        compiler_params=pltpu.CompilerParams(
            # Both grid axes are independent -> megacore/2-TC sharding on v7x;
            # harmless on single-TC v5e/v6e.
            dimension_semantics=("parallel", "parallel"),
            vmem_limit_bytes=vmem_limit,
        ),
    )(x)


def channel_shuffle(x, groups):
    """Pallas implementation of ChannelShuffle.forward for x of shape (B, C, L)."""
    B, C, L = x.shape
    assert C % groups == 0, "num_channels must be divisible by groups"

    if groups == 1 or groups == C:
        # Permutation is the identity; no data movement needed.
        return x

    itemsize = jnp.dtype(x.dtype).itemsize
    if itemsize < 4:
        # Pack pairs/quads along L into 32-bit words so the in-kernel strided
        # sublane loads stay 32-bit granular.
        # TODO(synk): run natively on bf16/int8 tiles (pure DMA permutation) to
        # drop the wrapper pack/unpack pass if xprof shows materialized copies.
        pack = 4 // itemsize
        xp, Lp = x, L
        if L % pack != 0:
            pad = pack - (L % pack)
            Lp = L + pad
            xp = jnp.pad(x, ((0, 0), (0, 0), (0, pad)))
        x32 = lax.bitcast_convert_type(
            xp.reshape(B, C, Lp // pack, pack), jnp.uint32)
        y32 = _channel_shuffle_impl(x32, groups)
        y = lax.bitcast_convert_type(y32, x.dtype).reshape(B, C, Lp)
        return y[:, :, :L] if Lp != L else y
    return _channel_shuffle_impl(x, groups)


def channel_shuffle_ref(x, groups):
    """Pure-JAX reference matching the PyTorch forward exactly."""
    B, C, L = x.shape
    cpg = C // groups
    y = x.reshape(B, groups, cpg, L)
    y = jnp.transpose(y, (0, 2, 1, 3))
    return y.reshape(B, C, L)


if __name__ == "__main__":
    key = jax.random.PRNGKey(0)
    k0, k1, k2, k3 = jax.random.split(key, 4)

    # 1) Small shape straight from the module spec: (batch=2, channels=4, length=16).
    B, C, L, groups = 2, 4, 16, 2
    x = jax.random.normal(k0, (B, C, L), dtype=jnp.float32)
    out = jax.block_until_ready(channel_shuffle(x, groups))
    ref = channel_shuffle_ref(x, groups)
    assert out.shape == ref.shape and out.dtype == ref.dtype
    assert jnp.array_equal(out, ref), "mismatch (f32 small)"

    # 2) Lane-dense path with groups > channels_per_group (strided-load span).
    B2, C2, L2, g2 = 2, 8, 512, 4
    x2 = jax.random.normal(k1, (B2, C2, L2), dtype=jnp.float32)
    out2 = jax.block_until_ready(channel_shuffle(x2, g2))
    assert jnp.array_equal(out2, channel_shuffle_ref(x2, g2)), "mismatch (f32 tiled)"

    # 3) bf16 path (packed along L to 32-bit words before the kernel).
    x3 = jax.random.normal(k2, (B, C, L), dtype=jnp.float32).astype(jnp.bfloat16)
    out3 = jax.block_until_ready(channel_shuffle(x3, groups))
    assert jnp.array_equal(out3, channel_shuffle_ref(x3, groups)), "mismatch (bf16)"

    # 4) Odd channels-per-group (C=6, groups=2 -> cpg=3) exercises uneven strides.
    B4, C4, L4, g4 = 2, 6, 128, 2
    x4 = jax.random.normal(k3, (B4, C4, L4), dtype=jnp.float32)
    out4 = jax.block_until_ready(channel_shuffle(x4, g4))
    assert jnp.array_equal(out4, channel_shuffle_ref(x4, g4)), "mismatch (f32 C=6)"

    print("KERNEL_OK")
</pallas_src>

<mosaic_0001>
module attributes {stable_mosaic.version = 11 : i64} {
  func.func @_channel_shuffle_kernel(%arg0: i32, %arg1: i32, %arg2: memref<2x4x16xf32, #tpu.memory_space<vmem>>, %arg3: memref<2x4x16xf32, #tpu.memory_space<vmem>>) attributes {dimension_semantics = [#tpu.dimension_semantics<parallel>, #tpu.dimension_semantics<parallel>], iteration_bounds = array<i64: 1, 1>, scalar_prefetch = 0 : i64, scratch_operands = 0 : i64, tpu.core_type = #tpu.core_type<tc>, window_params = [{transform_indices = @transform_0, window_bounds = array<i64: 2, 4, 16>}, {transform_indices = @transform_1, window_bounds = array<i64: 2, 4, 16>}]} {
    %c0 = arith.constant 0 : index
    %c0_0 = arith.constant 0 : index
    %c0_1 = arith.constant 0 : index
    %0 = tpu.strided_load %arg2[%c0, %c0_0, %c0_1] {strides = array<i32: 1, 2, 1>} : memref<2x4x16xf32, #tpu.memory_space<vmem>>, vector<2x2x16xf32>
    %c0_2 = arith.constant 0 : index
    %c0_3 = arith.constant 0 : index
    %c0_4 = arith.constant 0 : index
    %1 = vector.load %arg3[%c0_2, %c0_3, %c0_4] : memref<2x4x16xf32, #tpu.memory_space<vmem>>, vector<2x2x16xf32>
    tpu.vector_store %arg3[%c0_2, %c0_3, %c0_4], %0 {strides = array<i32>} : memref<2x4x16xf32, #tpu.memory_space<vmem>>, vector<2x2x16xf32>,
    %c0_5 = arith.constant 0 : index
    %c1 = arith.constant 1 : index
    %c0_6 = arith.constant 0 : index
    %2 = tpu.strided_load %arg2[%c0_5, %c1, %c0_6] {strides = array<i32: 1, 2, 1>} : memref<2x4x16xf32, #tpu.memory_space<vmem>>, vector<2x2x16xf32>
    %c0_7 = arith.constant 0 : index
    %c2 = arith.constant 2 : index
    %c0_8 = arith.constant 0 : index
    %3 = vector.load %arg3[%c0_7, %c2, %c0_8] : memref<2x4x16xf32, #tpu.memory_space<vmem>>, vector<2x2x16xf32>
    tpu.vector_store %arg3[%c0_7, %c2, %c0_8], %2 {strides = array<i32>} : memref<2x4x16xf32, #tpu.memory_space<vmem>>, vector<2x2x16xf32>,
    return
  }
  func.func @transform_0(%arg0: i32, %arg1: i32) -> (i32, i32, i32) {
    %c0_i32 = arith.constant 0 : i32
    %c0_i32_0 = arith.constant 0 : i32
    return %arg0, %c0_i32, %arg1 : i32, i32, i32
  }
  func.func @transform_1(%arg0: i32, %arg1: i32) -> (i32, i32, i32) {
    %c0_i32 = arith.constant 0 : i32
    %c0_i32_0 = arith.constant 0 : i32
    return %arg0, %c0_i32, %arg1 : i32, i32, i32
  }
}

</mosaic_0001>

<bundles_post_ra>
// kernel: tpu_custom_call.1
= control target key start
LH: loop header
LB: loop body
LE: loop exit
PB: predicated region body
PF: predicated region fallthrough
CT: control target
= control target key end

     0   :  { %6 = vsyncpa [#allocation3], 0  ;;  %s148_s0 = inlined_call_operand.hbm [shape: f32[2,4,16], index: 0, kind: input, shape index: {}]   ;;  %s149_s1 = inlined_call_operand.hbm [shape: f32[2,4,16], index: 1, kind: output, shape index: {}]  }
   0x1   :  { %7 = vsyncpa [#allocation4], 0  ;;  %s104_s6 = smov [#allocation2]   ;;  %s56_s10 = scalar_lea.hbm %s148_s0, 128 }
   0x2   :  { %s13_s7 = sshll.u32 %s104_s6, 4  ;;  %p57_p0 = scmp.ne.s32.totalorder %s148_s0, %s56_s10  ;;  %s14_s7 = int_to_ptr.vmem [resolvable:$true] %s13_s7 }
   0x3   :  { %p60_p1 = scmp.lt.u32.totalorder %s56_s10, %s148_s0 }
   0x5   :  { %p62_p2 = pnand %p60_p1, %p57_p0 }
   0x7   :  { %65 = shalt.err (!%p62_p2)
}
   0x8   :  { %s66_s15 = scalar_lea.vmem %s14_s7, 128  ;;  %p71_p4 = scmp.lt.s32.totalorder %s14_s7, %s14_s7 }
   0x9   :  { %p67_p3 = scmp.ne.s32.totalorder %s14_s7, %s66_s15  ;;  %p72_p5 = scmp.lt.s32.totalorder %s66_s15, %s66_s15 }
   0xb   :  { %p73_p6 = por %p72_p5, %p71_p4 }
   0xd   :  { %p74_p7 = pnand %p73_p6, %p67_p3 }
   0xf   :  { %77 = shalt.err (!%p74_p7)
}
  0x10   :  { %s105_s16 = smov 64   ;;  %s106_s17 = smov 4  }
  0x11   :  { %19 = dma.hbm_to_vmem [thread:$0]  %s148_s0, 128, %s14_s7, [#allocation3], %s105_s16, %s105_s16, %s106_s17  }
  0x12   :  { %100 = dma.done.wait [#allocation3], 128  }
  0x13   :  { %101 = vsyncadd [#allocation3], 4294967168  ;;  %s107_s20 = smov [#allocation5]   ;;  %vm26_vm0 = vcmask 123904  }
  0x14   :  { %s40_s21 = sshll.u32 %s107_s20, 4  ;;  %v23_v0 = vld [vmem:[#allocation2] ss:$2 sm:$0x3]  ;;  %s41_s21 = int_to_ptr.vmem [resolvable:$true] %s40_s21 }
  0x15   :  { %v25_v1 = vld [vmem:[#allocation2 + $0x4] ss:$2 sm:$0x3]  ;;  %27 = vst.msk [vmem:[#allocation5] sm:$0x3] %vm26_vm0, %v23_v0  ;;  %s78_s22 = scalar_lea.vmem %s41_s21, 128  ;;  %p83_p9 = scmp.lt.s32.totalorder %s41_s21, %s41_s21 }
  0x16   :  { %28 = vst.msk [vmem:[#allocation5 + $0x4] sm:$0x3] %vm26_vm0, %v25_v1  ;;  %v30_v2 = vld [vmem:[#allocation2 + $0x1] ss:$2 sm:$0x3]  ;;  %p79_p8 = scmp.ne.s32.totalorder %s41_s21, %s78_s22  ;;  %p84_p10 = scmp.lt.s32.totalorder %s78_s22, %s78_s22 }
  0x17   :  { %v32_v3 = vld [vmem:[#allocation2 + $0x5] ss:$2 sm:$0x3]  ;;  %33 = vst.msk [vmem:[#allocation5 + $0x2] sm:$0x3] %vm26_vm0, %v30_v2 }
  0x18   :  { %34 = vst.msk [vmem:[#allocation5 + $0x6] sm:$0x3] %vm26_vm0, %v32_v3  ;;  %p85_p11 = por %p84_p10, %p83_p9 }
  0x1a   :  { %p86_p12 = pnand %p85_p11, %p79_p8 }
  0x1c   :  { %89 = shalt.err (!%p86_p12)
}
  0x1d   :  { %s90_s24 = scalar_lea.hbm %s149_s1, 128 }
  0x1e   :  { %p91_p13 = scmp.ne.s32.totalorder %s149_s1, %s90_s24  ;;  %p94_p0 = scmp.lt.u32.totalorder %s90_s24, %s149_s1 }
  0x20   :  { %p96_p1 = pnand %p94_p0, %p91_p13 }
  0x22   :  { %99 = shalt.err (!%p96_p1)
}
  0x23   :  { %46 = dma.vmem_to_hbm [thread:$0]  %s41_s21, 128, %s149_s1, [#allocation4], %s105_s16, %s105_s16, %s106_s17  }
  0x24   :  { %102 = dma.done.wait [#allocation4], 128  }
  0x25   :  { %103 = vsyncadd [#allocation4], 4294967168 }
  0x26   :  { %50 = vsyncpa [#allocation3], 1 }
  0x27   :  { %51 = vsyncpa [#allocation4], 1 }

</bundles_post_ra>
